<compile_context>
chip_gen: v7x
topology: tpu7x:2x2x1
jax: 0.10.0
libtpu: 0.0.40
codegen_flags: <defaults>
</compile_context>

<pallas_src>
import functools

import jax
import jax.numpy as jnp
from jax.experimental import pallas as pl
from jax.experimental.pallas import tpu as pltpu


def user_encoder_kernel(hist_ref, wt_ref, b_ref, out_ref):
    # hist_ref: [B_TILE, N, H_in]            (native dtype)
    # wt_ref:   [H_in, H_out]                (pre-transposed, already / N)
    # b_ref:    [1, H_out]                   (f32)
    # out_ref:  [B_TILE, H_out]
    # Sum over the history axis in the native dtype (the 1/N of the mean is
    # folded into wt_ref), then a single MXU matmul with f32 accumulation.
    s = jnp.sum(hist_ref[...], axis=1)                       # [B_TILE, H_in]
    y = jnp.dot(s, wt_ref[...], preferred_element_type=jnp.float32)
    y = y + b_ref[...]                                       # f32 bias add
    out_ref[...] = y.astype(out_ref.dtype)


def prepare_user_encoder_params(weight, bias, num_history):
    """One-time parameter prep (torch nn.Linear layout -> kernel layout).

    weight: [H_out, H_in], bias: [H_out].  Folds the transpose and the 1/N
    mean scale here (parameter-load time), so neither is a per-call XLA op
    nor an in-kernel VPU multiply.
    """
    w_t_scaled = (weight.T / jnp.float32(num_history)).astype(weight.dtype)
    bias_2d = bias.reshape(1, -1).astype(jnp.float32)
    return w_t_scaled, bias_2d


@functools.partial(jax.jit, static_argnames=("b_tile",))
def user_encoder(history_vecs, w_t_scaled, bias_2d, *, b_tile=8):
    """history_vecs: [B, N, H_in]; w_t_scaled: [H_in, H_out]; bias_2d: [1, H_out]."""
    b, n, h_in = history_vecs.shape
    h_out = w_t_scaled.shape[1]

    # Pad the user axis up to a multiple of the block so the grid is exact.
    b_pad = pl.cdiv(b, b_tile) * b_tile
    if b_pad != b:
        history_vecs = jnp.pad(history_vecs, ((0, b_pad - b), (0, 0), (0, 0)))

    out = pl.pallas_call(
        user_encoder_kernel,
        out_shape=jax.ShapeDtypeStruct((b_pad, h_out), history_vecs.dtype),
        grid_spec=pltpu.PrefetchScalarGridSpec(
            num_scalar_prefetch=0,
            grid=(b_pad // b_tile,),
            in_specs=[
                pl.BlockSpec((b_tile, n, h_in), lambda i: (i, 0, 0)),
                pl.BlockSpec((h_in, h_out), lambda i: (0, 0)),
                pl.BlockSpec((1, h_out), lambda i: (0, 0)),
            ],
            out_specs=pl.BlockSpec((b_tile, h_out), lambda i: (i, 0)),
        ),
        compiler_params=pltpu.CompilerParams(
            dimension_semantics=("parallel",),  # v7x: shard users across TCs
        ),
    )(history_vecs, w_t_scaled, bias_2d)
    return out[:b]


if __name__ == "__main__":
    key = jax.random.PRNGKey(0)
    k_hist, k_w, k_b = jax.random.split(key, 3)

    num_users = 16     # batch of users -> grid of 2 steps with B_TILE=8 rows
    num_history = 8    # history vectors per user (mean axis of UserEncoder)
    hidden = 128       # news_dim / hidden_size (multiple of 128: lane-dense)

    # Batched history vectors (output of the NewsEncoder stage, one row per
    # history article per user) and deterministic synthetic nn.Linear params.
    history_vecs = jax.random.normal(
        k_hist, (num_users, num_history, hidden), dtype=jnp.float32)
    weight = jax.random.normal(k_w, (hidden, hidden), dtype=jnp.float32) * 0.1
    bias = jax.random.normal(k_b, (hidden,), dtype=jnp.float32) * 0.1

    # Parameter prep happens once (not in the per-call path).
    w_t_scaled, bias_2d = prepare_user_encoder_params(weight, bias, num_history)

    out = user_encoder(history_vecs, w_t_scaled, bias_2d, b_tile=8)
    out = jax.block_until_ready(out)

    # Reference in plain JAX: per-user mean over history then x @ W.T + b
    # (identical to torch UserEncoder.forward applied per user + cat).
    ref = jnp.mean(history_vecs, axis=1) @ weight.T + bias
    assert out.shape == (num_users, hidden)
    assert jnp.allclose(out, ref, atol=1e-5, rtol=1e-5), "mismatch vs reference"

    print("KERNEL_OK")
</pallas_src>

<mosaic_0001>
module attributes {stable_mosaic.version = 11 : i64} {
  func.func @user_encoder_kernel(%arg0: i32, %arg1: memref<8x8x128xf32, #tpu.memory_space<vmem>>, %arg2: memref<128x128xf32, #tpu.memory_space<vmem>>, %arg3: memref<1x128xf32, #tpu.memory_space<vmem>>, %arg4: memref<8x128xf32, #tpu.memory_space<vmem>>) attributes {dimension_semantics = [#tpu.dimension_semantics<parallel>], iteration_bounds = array<i64: 2>, scalar_prefetch = 0 : i64, scratch_operands = 0 : i64, tpu.core_type = #tpu.core_type<tc>, window_params = [{transform_indices = @transform_0, window_bounds = array<i64: 8, 8, 128>}, {pipeline_mode = #tpu.pipeline_mode<synchronous>, transform_indices = @transform_1, window_bounds = array<i64: 128, 128>}, {pipeline_mode = #tpu.pipeline_mode<synchronous>, transform_indices = @transform_2, window_bounds = array<i64: 1, 128>}, {transform_indices = @transform_3, window_bounds = array<i64: 8, 128>}]} {
    %c0 = arith.constant 0 : index
    %c0_0 = arith.constant 0 : index
    %c0_1 = arith.constant 0 : index
    %0 = vector.load %arg1[%c0, %c0_0, %c0_1] : memref<8x8x128xf32, #tpu.memory_space<vmem>>, vector<8x8x128xf32>
    %cst = arith.constant dense<0.000000e+00> : vector<8x128xf32>
    %1 = vector.multi_reduction <add>, %0, %cst [1] : vector<8x8x128xf32> to vector<8x128xf32>
    %c0_2 = arith.constant 0 : index
    %c0_3 = arith.constant 0 : index
    %2 = vector.load %arg2[%c0_2, %c0_3] : memref<128x128xf32, #tpu.memory_space<vmem>>, vector<128x128xf32>
    %cst_4 = arith.constant dense<0.000000e+00> : vector<8x128xf32>
    %3 = tpu.matmul %1, %2, %cst_4 {dimension_numbers = #tpu.dot_dimension_numbers<[1], [0], [0], [1], [0, 0, 1, 1], [], []>} : vector<8x128xf32>, vector<128x128xf32>, vector<8x128xf32> -> vector<8x128xf32>
    %c0_5 = arith.constant 0 : index
    %c0_6 = arith.constant 0 : index
    %4 = vector.load %arg3[%c0_5, %c0_6] : memref<1x128xf32, #tpu.memory_space<vmem>>, vector<1x128xf32>
    %5 = vector.broadcast %4 : vector<1x128xf32> to vector<8x128xf32>
    %6 = arith.addf %3, %5 : vector<8x128xf32>
    %c0_7 = arith.constant 0 : index
    %c0_8 = arith.constant 0 : index
    %7 = vector.load %arg4[%c0_7, %c0_8] : memref<8x128xf32, #tpu.memory_space<vmem>>, vector<8x128xf32>
    tpu.vector_store %arg4[%c0_7, %c0_8], %6 {strides = array<i32>} : memref<8x128xf32, #tpu.memory_space<vmem>>, vector<8x128xf32>,
    return
  }
  func.func @transform_0(%arg0: i32) -> (i32, i32, i32) {
    %c0_i32 = arith.constant 0 : i32
    %c0_i32_0 = arith.constant 0 : i32
    %c0_i32_1 = arith.constant 0 : i32
    return %arg0, %c0_i32, %c0_i32_0 : i32, i32, i32
  }
  func.func @transform_1(%arg0: i32) -> (i32, i32) {
    %c0_i32 = arith.constant 0 : i32
    %c0_i32_0 = arith.constant 0 : i32
    %c0_i32_1 = arith.constant 0 : i32
    return %c0_i32, %c0_i32_0 : i32, i32
  }
  func.func @transform_2(%arg0: i32) -> (i32, i32) {
    %c0_i32 = arith.constant 0 : i32
    %c0_i32_0 = arith.constant 0 : i32
    %c0_i32_1 = arith.constant 0 : i32
    return %c0_i32, %c0_i32_0 : i32, i32
  }
  func.func @transform_3(%arg0: i32) -> (i32, i32) {
    %c0_i32 = arith.constant 0 : i32
    %c0_i32_0 = arith.constant 0 : i32
    return %arg0, %c0_i32 : i32, i32
  }
}

</mosaic_0001>

<bundles_post_ra>
// kernel: user_encoder.1
= control target key start
LH: loop header
LB: loop body
LE: loop exit
PB: predicated region body
PF: predicated region fallthrough
CT: control target
= control target key end

     0   :  { %8 = vsyncpa [#allocation3], 0  ;;  %s1013_s0 = inlined_call_operand.hbm [shape: f32[16,8,128], index: 0, kind: input, shape index: {}]   ;;  %s1014_s1 = inlined_call_operand.hbm [shape: f32[128,128], index: 1, kind: input, shape index: {}]   ;;  %s1015_s2 = inlined_call_operand.vmem [shape: f32[1,128], index: 2, kind: input, shape index: {}]   ;;  %s1016_s3 = inlined_call_operand.hbm [shape: f32[16,128], index: 3, kind: output, shape index: {}]  }
   0x1   :  { %10 = vsyncpa [#allocation3 + $0x1], 0 }
   0x2   :  { %11 = vsyncpa [#allocation6], 0 }
   0x3   :  { %12 = vsyncpa [#allocation4], 0 }
   0x4   :  { %14 = vsyncpa [#allocation4 + $0x1], 0  ;;  %s785_s12 = smov 0   ;;  %s787_s13 = smov 0  }
   0x5   :  { %s789_s14 = smov 0   ;;  %s791_s15 = smov 0  }
   0x6 LB: > { %s806_s16 = sadd.s32 4294967295, %s755_s15   ;;  %s472_s17 = sadd.s32 4294967294, %s755_s15   ;;  %s755_s15 = sphi %s791_s15, %s1036_s15   ;;  %s751_s14 = sphi %s789_s14, %s1035_s14   ;;  %s747_s13 = sphi %s787_s13, %s1034_s13   ;;  %s743_s12 = sphi %s785_s12, %s1033_s12  }
   0x7   : > { %p40_p0 = scmp.ne.s32.totalorder %s747_s13, %s743_s12  ;;  %p1017_p1 = scmp.eq.s32.totalorder %s806_s16, 0 }
   0x8   : > { %p112_p3 = scmp.eq.s32.totalorder %s472_s17, 1  ;;  %p473_p5 = scmp.ge.s32.totalorder %s755_s15, 1 }
   0x9   : > { %p815_p4 = por %p1017_p1, %p40_p0  ;;  %p119_p7 = scmp.lt.s32.totalorder %s755_s15, 3 }
   0xa   : > { %p820_p6 = por %p112_p3, %p40_p0  ;;  %s757_s21 = smov [#allocation5]  }
   0xb   : > { %s1020_s18 = scalar_select %p815_p4, 1, 0 }
   0xc   : > { %s1021_s19 = scalar_select %p820_p6, 1, 0 }
   0xd   : > { %p825_p8 = pnand %p473_p5, %p119_p7  ;;  %s131_s22 = sshll.u32 %s757_s21, 4  ;;  %s829_s22 = int_to_ptr.vmem [resolvable:$true] %s131_s22 }
   0xe   : > { %s841_s24 = sadd.s32 1, %s755_s15   ;;  %s27_s25 = sadd.s32 1, %s751_s14 }
   0xf   : > { %s1022_s20 = scalar_select %p825_p8, 1, 0 }
  0x10   : > { %p573_p9 = pneg %p825_p8  ;;  %s24_s26 = ssub.s32 %s755_s15, %s841_s24 }
  0x11   : > { %s627_s29 = scalar_lea.hbm %s1014_s1, 2048 }
  0x12   : > { %p836_p11 = pnand %p573_p9, %p1017_p1  ;;  %p628_p12 = scmp.ne.s32.totalorder %s1014_s1, %s627_s29 }
  0x13   : > { %p634_p5 = scmp.lt.u32.totalorder %s627_s29, %s1014_s1 }
  0x14   : > { %p629_p13 = pneg %p836_p11 }
  0x16   : > { %p630_p0 = pnand %p629_p13, %p628_p12 }
  0x18   : > { %p631_p3 = pneg %p630_p0 }
  0x1a   : > { %p636_p7 = pnand %p634_p5, %p631_p3 }
  0x1c   : > { %639 = shalt.err (!%p636_p7)
}
  0x1d   : > { %s640_s7 = scalar_lea.vmem %s829_s22, 2048  ;;  %p648_p2 = scmp.lt.s32.totalorder %s829_s22, %s829_s22 }
  0x1e   : > { %p641_p9 = scmp.ne.s32.totalorder %s829_s22, %s640_s7  ;;  %p649_p6 = scmp.lt.s32.totalorder %s640_s7, %s640_s7 }
  0x20   : > { %p643_p10 = pnand %p641_p9, %p629_p13  ;;  %p650_p4 = por %p649_p6, %p648_p2 }
  0x22   : > { %p644_p1 = pneg %p643_p10 }
  0x24   : > { %p651_p8 = pnand %p650_p4, %p644_p1 }
  0x26   : > { %654 = shalt.err (!%p651_p8)
}
  0x27   : > { %s758_s8 = smov 128   ;;  %s759_s9 = smov 8  }
  0x28   : > { %576 = dma.hbm_to_vmem [thread:$0]  (!%p836_p11), %s1014_s1, 2048, %s829_s22, [#allocation6], %s758_s8, %s758_s8, %s759_s9  }
  0x29   : > { %p25_p1 = scmp.eq.s32.totalorder %s24_s26, 0  ;;  %p34_p2 = scmp.ne.s32.totalorder %s751_s14, %s747_s13 }
  0x2a   : > { %p35_p4 = scmp.eq.s32.totalorder %s755_s15, 0  ;;  %p586_p6 = scmp.lt.s32.totalorder %s755_s15, 2 }
  0x2b   : > { %s875_s17 = scalar_select %p25_p1, %s751_s14, %s27_s25  }
  0x2c   : > { %p36_p8 = por %p35_p4, %p34_p2  ;;  %p1024_p10 = scmp.eq.s32.totalorder %s806_s16, 1 }
  0x2d   : > { %s148_s23 = sand.u32 1, %s751_s14   ;;  %s488_s27 = sshll.u32 %s755_s15, 10 }
  0x2e   : > { %p879_p12 = por %p1024_p10, %p34_p2  ;;  %s476_s28 = sshll.u32 %s148_s23, 6 }
  0x2f   : > { %s888_s4 = scalar_lea.hbm %s1013_s0, %s488_s27  ;;  %s152_s22 = scalar_lea.vmem [#allocation2], %s476_s28 }
  0x30   : > { %s159_s25 = sshll.u32 %s152_s22, 4  ;;  %p890_p11 = pnand %p586_p6, %p36_p8  ;;  %s894_s25 = int_to_ptr.vmem [resolvable:$true] %s159_s25 }
  0x31   : > { %s896_s5 = scalar_lea.sflag [#allocation3], %s148_s23  ;;  %s655_s6 = scalar_lea.hbm %s888_s4, 1024 }
  0x32   : > { %p656_p13 = scmp.ne.s32.totalorder %s888_s4, %s655_s6  ;;  %p657_p0 = pneg %p890_p11 }
  0x33   : > { %s660_s11 = scalar_lea.hbm %s1013_s0, 2048  ;;  %p661_p7 = scmp.lt.u32.totalorder %s888_s4, %s1013_s0 }
  0x34   : > { %p658_p3 = pnand %p657_p0, %p656_p13  ;;  %p662_p9 = scmp.lt.u32.totalorder %s660_s11, %s655_s6 }
  0x35   : > { %p664_p2 = scmp.lt.u32.totalorder %s655_s6, %s888_s4 }
  0x36   : > { %p659_p5 = pneg %p658_p3  ;;  %p663_p1 = por %p662_p9, %p661_p7 }
  0x38   : > { %p665_p4 = por %p664_p2, %p663_p1 }
  0x3a   : > { %p666_p6 = pnand %p665_p4, %p659_p5 }
  0x3c   : > { %669 = shalt.err (!%p666_p6)
}
  0x3d   : > { %s670_s23 = scalar_lea.vmem %s894_s25, 1024  ;;  %s760_s29 = smov [#allocation2]  }
  0x3e   : > { %p671_p8 = scmp.ne.s32.totalorder %s894_s25, %s670_s23  ;;  %s675_s30 = sshll.u32 %s760_s29, 4  ;;  %s676_s30 = int_to_ptr.vmem [resolvable:$false] %s675_s30 }
  0x3f   : > { %s677_s22 = scalar_lea.vmem %s676_s30, 2048  ;;  %p678_p3 = scmp.lt.s32.totalorder %s894_s25, %s676_s30 }
  0x40   : > { %p673_p10 = pnand %p671_p8, %p657_p0  ;;  %p679_p7 = scmp.lt.s32.totalorder %s677_s22, %s670_s23 }
  0x42   : > { %p674_p13 = pneg %p673_p10  ;;  %p680_p9 = por %p679_p7, %p678_p3 }
  0x44   : > { %p681_p1 = pnand %p680_p9, %p674_p13 }
  0x46   : > { %684 = shalt.err (!%p681_p1)
}
  0x47   : > { %580 = dma.hbm_to_vmem [thread:$0]  (!%p890_p11), %s888_s4, 1024, %s894_s25, %s896_s5, %s758_s8, %s758_s8, %s759_s9  }
  0x48   : > { %p1027_p0 = scmp.ne.s32.totalorder %s1022_s20, 0 }
  0x49   : > { %s930_s6 = sand.u32 (!%p1027_p0), 1, %s747_s13   ;;  %p1028_p5 = scmp.ne.s32.totalorder (!%p1027_p0), %s1020_s18, 0 }
  0x4a   : > { %171 = sbr.rel (%p1027_p0) target bundleno = 347 (0x15b), region = 32  ;;  %s480_s7 = sshll.u32 (!%p1027_p0), %s930_s6, 6 }
  0x4b   : > { %s174_s10 = scalar_lea.sflag (!%p1027_p0), [#allocation3], %s930_s6  ;;  %s934_s11 = scalar_lea.vmem (!%p1027_p0), [#allocation2], %s480_s7 }
  0x51   : > { %730 = dma.done.wait (%p1028_p5), %s174_s10, 1024  }
  0x52   : > { %732 = vsyncadd (%p1028_p5), %s174_s10, 4294966272  ;;  %p1029_p11 = scmp.eq.s32.totalorder %s806_s16, 0 }
  0x54   : > { %734 = dma.done.wait (%p1029_p11), [#allocation6], 2048   ;;  %p1030_p2 = pmov %p1029_p11 }
  0x55   : > { %v761_v0 = vmov 0.0|0.0   ;;  %vm762_vm0 = vmmov 0   ;;  %v763_v1 = vmov 0.0   ;;  %v261_v2 = vld [vmem:[#allocation5] sm:$0xff]  ;;  %v262_v3 = vld [vmem:[#allocation5 + $0x8] sm:$0xff]  ;;  %v263_v4 = vld [vmem:[#allocation5 + $0x10] sm:$0xff] }
  0x56   : > { %736 = vsyncadd (%p1030_p2), [#allocation6], 4294965248  ;;  %541 = vmatprep.subr.bf16.mxu0 %v761_v0  ;;  %538 = vmatprep.mubr.msk.f32.mxu0 %vm762_vm0, %v763_v1  ;;  %v542_v5 = vpack.c.bf16 %v262_v3, %v261_v2  ;;  %v264_v6 = vld [vmem:[#allocation5 + $0x18] sm:$0xff]  ;;  %v265_v8 = vld [vmem:[#allocation5 + $0x20] sm:$0xff]  ;;  %vm292_vm1 = vcmask 1041409   ;;  %vm294_vm2 = vcmask 1042434  }
  0x57   : > { %v545_v7 = vpack.c.bf16 %v264_v6, %v263_v4  ;;  %v266_v9 = vld [vmem:[#allocation5 + $0x28] sm:$0xff]  ;;  %v267_v10 = vld [vmem:[#allocation5 + $0x30] sm:$0xff]  ;;  %v268_v11 = vld [vmem:[#allocation5 + $0x38] sm:$0xff]  ;;  %vm296_vm3 = vcmask 1043459   ;;  %vm298_vm4 = vcmask 1044484   ;;  %vm300_vm5 = vcmask 1045509  }
  0x58   : > { %543 = vmatpush3.bf16.msra.mxu0 %v542_v5  ;;  %v205_v12 = vld [vmem:[%s934_s11] sm:$0xff]  ;;  %v206_v13 = vld [vmem:[%s934_s11 + $0x8] sm:$0xff]  ;;  %v548_v14 = vpack.c.bf16 %v266_v9, %v265_v8  ;;  %v207_v15 = vld [vmem:[%s934_s11 + $0x10] sm:$0xff]  ;;  %v551_v20 = vpack.c.bf16 %v268_v11, %v267_v10  ;;  %vm302_vm6 = vcmask 1046534   ;;  %vm304_vm7 = vcmask 1047559   ;;  %s482_s18 = sshll.u32 %s930_s6, 3 }
  0x59   : > { %544 = vmatprep.subr.bf16.mxu0 %v761_v0  ;;  %v208_v16 = vld [vmem:[%s934_s11 + $0x18] sm:$0xff]  ;;  %v209_v17 = vld [vmem:[%s934_s11 + $0x20] sm:$0xff]  ;;  %v213_v18 = vrot.slane %v205_v12, 4  ;;  %v219_v19 = vrot.slane %v206_v13, 4  ;;  %v210_v21 = vld [vmem:[%s934_s11 + $0x28] sm:$0xff]  ;;  %v225_v24 = vrot.slane %v207_v15, 4 }
  0x5a   : > { %v211_v22 = vld [vmem:[%s934_s11 + $0x30] sm:$0xff]  ;;  %v212_v23 = vld [vmem:[%s934_s11 + $0x38] sm:$0xff]  ;;  %v231_v25 = vrot.slane %v208_v16, 4  ;;  %v237_v26 = vrot.slane %v209_v17, 4  ;;  %v243_v29 = vrot.slane %v210_v21, 4  ;;  %v269_v39 = vld [vmem:[#allocation5 + $0x40] sm:$0xff] }
  0x5b   : > { %v214_v27 = vadd.f32 %v213_v18, %v205_v12  ;;  %v220_v28 = vadd.f32 %v219_v19, %v206_v13  ;;  %v249_v30 = vrot.slane %v211_v22, 4  ;;  %v226_v31 = vadd.f32 %v225_v24, %v207_v15  ;;  %v270_v40 = vld [vmem:[#allocation5 + $0x48] sm:$0xff]  ;;  %v271_v60 = vld [vmem:[#allocation5 + $0x50] sm:$0xff]  ;;  %v272_v61 = vld [vmem:[#allocation5 + $0x58] sm:$0xff]  ;;  %s485_s9 = sshll.u32 %s806_s16, 7  ;;  %s203_s4 = scalar_lea.vmem [#allocation7], %s482_s18 }
  0x5c   : > { %546 = vmatpush3.bf16.msra.mxu0 %v545_v7  ;;  %v232_v32 = vadd.f32 %v231_v25, %v208_v16  ;;  %v238_v33 = vadd.f32 %v237_v26, %v209_v17  ;;  %v255_v34 = vrot.slane %v212_v23, 4  ;;  %v244_v37 = vadd.f32 %v243_v29, %v210_v21  ;;  %v273_v10 = vld [vmem:[#allocation5 + $0x60] sm:$0xff]  ;;  %v274_v11 = vld [vmem:[#allocation5 + $0x68] sm:$0xff]  ;;  %v275_v18 = vld [vmem:[#allocation5 + $0x70] sm:$0xff]  ;;  %s392_s25 = sshll.u32 %s203_s4, 4  ;;  %s969_s27 = scalar_lea.hbm %s1016_s3, %s485_s9  ;;  %s971_s25 = int_to_ptr.vmem [resolvable:$true] %s392_s25 }
  0x5d   : > { %547 = vmatprep.subr.bf16.mxu0 %v761_v0  ;;  %v215_v35 = vrot.slane %v214_v27, 2  ;;  %v221_v36 = vrot.slane %v220_v28, 2  ;;  %v250_v38 = vadd.f32 %v249_v30, %v211_v22  ;;  %v227_v41 = vrot.slane %v226_v31, 2  ;;  %v276_v19 = vld [vmem:[#allocation5 + $0x78] sm:$0xff]  ;;  %v483_v26 = vld [vmem:[%s1015_s2] ss:$0 sm:$0xff] }
  0x5e   : > { %v233_v42 = vrot.slane %v232_v32, 2  ;;  %v239_v43 = vrot.slane %v238_v33, 2  ;;  %v256_v44 = vadd.f32 %v255_v34, %v212_v23  ;;  %v245_v47 = vrot.slane %v244_v37, 2  ;;  %s379_s28 = scalar_lea.sflag [#allocation4], %s930_s6  ;;  %s685_s23 = scalar_lea.vmem %s971_s25, 128 }
  0x5f   : > { %v216_v45 = vadd.f32 %v215_v35, %v214_v27  ;;  %v222_v46 = vadd.f32 %v221_v36, %v220_v28  ;;  %v251_v48 = vrot.slane %v250_v38, 2  ;;  %v228_v49 = vadd.f32 %v227_v41, %v226_v31  ;;  %p686_p4 = scmp.ne.s32.totalorder %s971_s25, %s685_s23  ;;  %s764_s16 = smov [#allocation7]  }
  0x60   : > { %549 = vmatpush3.bf16.msra.mxu0 %v548_v14  ;;  %v234_v50 = vadd.f32 %v233_v42, %v232_v32  ;;  %v240_v51 = vadd.f32 %v239_v43, %v238_v33  ;;  %v554_v52 = vpack.c.bf16 %v270_v40, %v269_v39  ;;  %v246_v55 = vadd.f32 %v245_v47, %v244_v37  ;;  %s689_s29 = sshll.u32 %s764_s16, 4  ;;  %s690_s29 = int_to_ptr.vmem [resolvable:$false] %s689_s29 }
  0x61   : > { %550 = vmatprep.subr.bf16.mxu0 %v761_v0  ;;  %v217_v53 = vrot.slane %v216_v45, 1  ;;  %v223_v54 = vrot.slane %v222_v46, 1  ;;  %v229_v56 = vrot.slane %v228_v49, 1  ;;  %v257_v59 = vrot.slane %v256_v44, 2  ;;  %p687_p6 = pnand %p686_p4, %p879_p12  ;;  %s691_s30 = scalar_lea.vmem %s690_s29, 256 }
  0x62   : > { %v235_v57 = vrot.slane %v234_v50, 1  ;;  %v241_v58 = vrot.slane %v240_v51, 1  ;;  %v252_v1 = vadd.f32 %v251_v48, %v250_v38  ;;  %v247_v4 = vrot.slane %v246_v55, 1  ;;  %p692_p10 = scmp.lt.s32.totalorder %s971_s25, %s690_s29  ;;  %p693_p13 = scmp.lt.s32.totalorder %s691_s30, %s685_s23 }
  0x63   : > { %v218_v62 = vadd.f32 %v217_v53, %v216_v45  ;;  %v224_v63 = vadd.f32 %v223_v54, %v222_v46  ;;  %v230_v2 = vadd.f32 %v229_v56, %v228_v49  ;;  %v557_v7 = vpack.c.bf16 %v272_v61, %v271_v60  ;;  %p688_p8 = pneg %p687_p6 }
  0x64   : > { %552 = vmatpush3.bf16.msra.mxu0 %v551_v20  ;;  %v236_v3 = vadd.f32 %v235_v57, %v234_v50  ;;  %v242_v5 = vadd.f32 %v241_v58, %v240_v51  ;;  %v258_v8 = vadd.f32 %v257_v59, %v256_v44  ;;  %v253_v12 = vrot.slane %v252_v1, 1  ;;  %p694_p3 = por %p693_p13, %p692_p10 }
  0x65   : > { %553 = vmatprep.subr.bf16.mxu0 %v761_v0  ;;  %v293_v6 = vsel %vm292_vm1, %v224_v63, %v218_v62  ;;  %v248_v14 = vadd.f32 %v247_v4, %v246_v55  ;;  %v560_v16 = vpack.c.bf16 %v274_v11, %v273_v10  ;;  %v563_v22 = vpack.c.bf16 %v276_v19, %v275_v18 }
  0x66   : > { %v295_v9 = vsel %vm294_vm2, %v230_v2, %v293_v6  ;;  %v259_v17 = vrot.slane %v258_v8, 1  ;;  %v254_v20 = vadd.f32 %v253_v12, %v252_v1  ;;  %p695_p7 = pnand %p694_p3, %p688_p8 }
  0x67   : > { %v297_v13 = vsel %vm296_vm3, %v236_v3, %v295_v9 }
  0x68   : > { %555 = vmatpush3.bf16.msra.mxu0 %v554_v52  ;;  %v299_v15 = vsel %vm298_vm4, %v242_v5, %v297_v13  ;;  %v260_v23 = vadd.f32 %v259_v17, %v258_v8 }
  0x69   : > { %556 = vmatprep.subr.bf16.mxu0 %v761_v0  ;;  %v301_v21 = vsel %vm300_vm5, %v248_v14, %v299_v15 }
  0x6a   : > { %v303_v24 = vsel %vm302_vm6, %v254_v20, %v301_v21 }
  0x6b   : > { %v305_v25 = vsel %vm304_vm7, %v260_v23, %v303_v24 }
  0x6c   : > { %558 = vmatpush3.bf16.msra.mxu0 %v557_v7 }
  0x6d   : > { %559 = vmatprep.subr.bf16.mxu0 %v761_v0 }
  0x70   : > { %561 = vmatpush3.bf16.msra.mxu0 %v560_v16 }
  0x71   : > { %562 = vmatprep.subr.bf16.mxu0 %v761_v0 }
  0x74   : > { %564 = vmatpush3.bf16.msra.mxu0 %v563_v22 }
  0x77   : > { %539 = vmatmul.mubr.f32.vlgmr.msra.gmra.mrb[0].mxu0 %v305_v25 }
 0x14a   : > { %v373_v27 = vpop.f32.mrb[0].mxu0 }
 0x14b   : > { %v374_v28 = vadd.f32 %v483_v26, %v373_v27  ;;  %v540_v29 = vpop.f32.mrb[1].mxu0 }
 0x14d   : > { %377 = vst [vmem:[%s203_s4] sm:$0xff] %v374_v28 }
 0x14e   : > { %698 = shalt.err (!%p695_p7)
}
 0x14f   : > { %s699_s22 = scalar_lea.hbm %s969_s27, 128  ;;  %s703_s10 = scalar_lea.hbm %s1016_s3, 256 }
 0x150   : > { %p700_p9 = scmp.ne.s32.totalorder %s969_s27, %s699_s22  ;;  %p704_p5 = scmp.lt.u32.totalorder %s969_s27, %s1016_s3 }
 0x151   : > { %p705_p11 = scmp.lt.u32.totalorder %s703_s10, %s699_s22  ;;  %p707_p4 = scmp.lt.u32.totalorder %s699_s22, %s969_s27 }
 0x152   : > { %p701_p1 = pnand %p700_p9, %p879_p12 }
 0x153   : > { %p706_p2 = por %p705_p11, %p704_p5 }
 0x154   : > { %p702_p0 = pneg %p701_p1 }
 0x155   : > { %p708_p6 = por %p707_p4, %p706_p2 }
 0x157   : > { %p709_p8 = pnand %p708_p6, %p702_p0 }
 0x159   : > { %712 = shalt.err (!%p709_p8)
}
 0x15a   : > { %571 = dma.vmem_to_hbm [thread:$0]  (%p879_p12), %s971_s25, 128, %s969_s27, %s379_s28  }
 0x15b PF: > { %s404_s20 = sand.u32 1, %s743_s12   ;;  %p1031_p10 = scmp.ne.s32.totalorder %s1021_s19, 0 }
 0x15c   : > { %p1032_p13 = scmp.ge.s32.totalorder %s755_s15, 2  ;;  %s405_s8 = scalar_lea.sflag [#allocation4], %s404_s20 }
 0x15e   : > { %p582_p3 = pnand %p1032_p13, %p1031_p10 }
 0x160   : > { %738 = dma.done.wait (!%p582_p3), %s405_s8, 128  }
 0x161   : > { %740 = vsyncadd (!%p582_p3), %s405_s8, 4294967168  ;;  %p17_p7 = scmp.ge.s32.totalorder %s841_s24, 4   ;;  %s1033_s12 = smov %s747_s13 }
 0x162   : > { %s1034_s13 = smov %s751_s14  ;;  %s1035_s14 = smov %s875_s17 }
 0x163   : > { %s1036_s15 = smov %s841_s24  ;;  %19 = sbr.rel (!%p17_p7) target bundleno = 6 (0x6), region = 81 }
 0x16a   :  { %410 = vsyncpa [#allocation3], 1 }
 0x16b   :  { %412 = vsyncpa [#allocation3 + $0x1], 1 }
 0x16c   :  { %413 = vsyncpa [#allocation6], 1 }
 0x16d   :  { %414 = vsyncpa [#allocation4], 1 }
 0x16e   :  { %416 = vsyncpa [#allocation4 + $0x1], 1 }

</bundles_post_ra>
